<compile_context>
chip_gen: v5e
topology: v5e:2x2
jax: 0.10.0
libtpu: 0.0.40
codegen_flags: <defaults>
</compile_context>

<pallas_src>
import jax
import jax.numpy as jnp
from jax.experimental import pallas as pl
from jax.experimental.pallas import tpu as pltpu


def _generator_kernel(x_ref, w1_ref, b1_ref, w2_ref, b2_ref, w3_ref, b3_ref,
                      o_ref):
    """Whole MLP forward for one batch tile, fused in VMEM."""
    x = x_ref[...]                                   # keep native dtype (bf16 ok)

    # map1 + tanh  (f32 accumulate, f32 activation math)
    h1 = jnp.dot(x, w1_ref[...], preferred_element_type=jnp.float32)
    h1 = jnp.tanh(h1 + b1_ref[...].astype(jnp.float32))
    h1 = h1.astype(w2_ref.dtype)                     # native-rate MXU for layer 2

    # map2 + tanh
    h2 = jnp.dot(h1, w2_ref[...], preferred_element_type=jnp.float32)
    h2 = jnp.tanh(h2 + b2_ref[...].astype(jnp.float32))
    h2 = h2.astype(w3_ref.dtype)

    # map3 (no activation, per reference module)
    out = jnp.dot(h2, w3_ref[...], preferred_element_type=jnp.float32)
    out = out + b3_ref[...].astype(jnp.float32)

    o_ref[...] = out.astype(o_ref.dtype)


def _round_up(x, m):
    return (x + m - 1) // m * m


def _pick_batch_tile(B):
    """Sublane-aligned batch tile.

    Targets >= 2 grid steps when B > 8 so the 'parallel' batch axis shards
    across both v7x TensorCores, and caps the tile at 1024 rows (per-step VMEM
    stays a few hundred KB on every generation)."""
    half = _round_up(max(pl.cdiv(B, 2), 1), 8)
    return max(8, min(1024, half))


def generator_forward(x, params, *, batch_tile=None):
    """params = (w1, b1, w2, b2, w3, b3) with w_i as [in, out], b_i as [1, out]."""
    w1, b1, w2, b2, w3, b3 = params
    B, in_dim = x.shape
    hid = w1.shape[1]
    out_dim = w3.shape[1]
    dtype = x.dtype

    if batch_tile is None:
        tb = _pick_batch_tile(B)
    else:
        tb = max(8, _round_up(int(batch_tile), 8))   # enforce sublane multiple

    grid = (pl.cdiv(B, tb),)                         # ragged last tile is masked

    # ---- cost estimate from REAL dims (helps XLA schedule neighbours) ------
    itemsize = jnp.dtype(dtype).itemsize
    flops = 2 * B * (in_dim * hid + hid * hid + hid * out_dim)
    transcendentals = 2 * B * hid                    # two tanh layers
    bytes_accessed = (x.nbytes + w1.nbytes + b1.nbytes + w2.nbytes + b2.nbytes
                      + w3.nbytes + b3.nbytes + B * out_dim * itemsize)

    # Weights/biases: full-array blocks, constant index_map -> resident in VMEM
    # across all grid steps (only a few KB unpadded).
    full = lambda shape: pl.BlockSpec(shape, lambda i: (0,) * len(shape))

    out = pl.pallas_call(
        _generator_kernel,
        out_shape=jax.ShapeDtypeStruct((B, out_dim), dtype),
        grid_spec=pltpu.PrefetchScalarGridSpec(
            num_scalar_prefetch=0,
            grid=grid,
            in_specs=[
                pl.BlockSpec((tb, in_dim), lambda i: (i, 0)),   # x tile, true width
                full(w1.shape), full(b1.shape),
                full(w2.shape), full(b2.shape),
                full(w3.shape), full(b3.shape),
            ],
            out_specs=pl.BlockSpec((tb, out_dim), lambda i: (i, 0)),  # true width
        ),
        compiler_params=pltpu.CompilerParams(
            dimension_semantics=("parallel",)),
        cost_estimate=pl.CostEstimate(flops=flops,
                                      transcendentals=transcendentals,
                                      bytes_accessed=bytes_accessed),
    )(x, w1, b1, w2, b2, w3, b3)

    return out


def init_generator_params(key, input_size, hidden_size, output_size,
                          dtype=jnp.float32):
    """Deterministic init mimicking nn.Linear default: U(-1/sqrt(fan_in), +)."""
    def linear(key, fan_in, fan_out):
        kw, kb = jax.random.split(key)
        bound = 1.0 / (fan_in ** 0.5)
        w = jax.random.uniform(kw, (fan_in, fan_out), dtype,
                               minval=-bound, maxval=bound)
        b = jax.random.uniform(kb, (1, fan_out), dtype,
                               minval=-bound, maxval=bound)
        return w, b

    k1, k2, k3 = jax.random.split(key, 3)
    w1, b1 = linear(k1, input_size, hidden_size)
    w2, b2 = linear(k2, hidden_size, hidden_size)
    w3, b3 = linear(k3, hidden_size, output_size)
    return (w1, b1, w2, b2, w3, b3)


def generator_reference(x, params):
    """Plain-JAX reference matching the PyTorch forward semantics."""
    w1, b1, w2, b2, w3, b3 = params
    h = jnp.tanh(x @ w1 + b1)
    h = jnp.tanh(h @ w2 + b2)
    return h @ w3 + b3


if __name__ == "__main__":
    # Small shapes consistent with the module: input_size=8, hidden=32, output=8
    batch = 8
    input_size = 8
    hidden_size = 32
    output_size = 8

    key = jax.random.PRNGKey(0)
    kx, kp, kx2 = jax.random.split(key, 3)

    x = jax.random.normal(kx, (batch, input_size), dtype=jnp.float32)
    params = init_generator_params(kp, input_size, hidden_size, output_size)

    out = jax.block_until_ready(generator_forward(x, params))
    ref = generator_reference(x, params)
    assert out.shape == (batch, output_size)
    assert jnp.allclose(out, ref, atol=1e-5, rtol=1e-5), "mismatch vs reference"

    # Multi-step / ragged-grid path: B=1040 -> tb=528, grid=2, last tile
    # overhangs by 16 rows (masked by Pallas), no wrapper-side padding.
    big_batch = 1040
    x_big = jax.random.normal(kx2, (big_batch, input_size), dtype=jnp.float32)
    out_big = jax.block_until_ready(generator_forward(x_big, params))
    ref_big = generator_reference(x_big, params)
    assert out_big.shape == (big_batch, output_size)
    assert jnp.allclose(out_big, ref_big, atol=1e-4, rtol=1e-4), \
        "tiled-path mismatch vs reference"

    # bf16 operand path (native MXU rate on v6e/v7x, halves DMA bytes); the
    # kernel keeps f32 accumulation and f32 bias/tanh math, so tolerance only
    # needs to cover bf16 inter-layer downcasts + bf16 output quantization.
    x_bf = x.astype(jnp.bfloat16)
    params_bf = tuple(p.astype(jnp.bfloat16) for p in params)
    out_bf = jax.block_until_ready(generator_forward(x_bf, params_bf))
    ref_bf = generator_reference(x_bf.astype(jnp.float32),
                                 tuple(p.astype(jnp.float32) for p in params_bf))
    assert out_bf.shape == (batch, output_size)
    assert jnp.allclose(out_bf.astype(jnp.float32), ref_bf,
                        atol=5e-2, rtol=5e-2), "bf16-path mismatch vs reference"

    print("KERNEL_OK")
</pallas_src>

<mosaic_0001>
module attributes {stable_mosaic.version = 11 : i64} {
  func.func @_generator_kernel(%arg0: i32, %arg1: memref<8x8xf32, #tpu.memory_space<vmem>>, %arg2: memref<8x32xf32, #tpu.memory_space<vmem>>, %arg3: memref<1x32xf32, #tpu.memory_space<vmem>>, %arg4: memref<32x32xf32, #tpu.memory_space<vmem>>, %arg5: memref<1x32xf32, #tpu.memory_space<vmem>>, %arg6: memref<32x8xf32, #tpu.memory_space<vmem>>, %arg7: memref<1x8xf32, #tpu.memory_space<vmem>>, %arg8: memref<8x8xf32, #tpu.memory_space<vmem>>) attributes {dimension_semantics = [#tpu.dimension_semantics<parallel>], iteration_bounds = array<i64: 1>, scalar_prefetch = 0 : i64, scratch_operands = 0 : i64, tpu.core_type = #tpu.core_type<tc>, window_params = [{transform_indices = @transform_0, window_bounds = array<i64: 8, 8>}, {pipeline_mode = #tpu.pipeline_mode<synchronous>, transform_indices = @transform_1, window_bounds = array<i64: 8, 32>}, {pipeline_mode = #tpu.pipeline_mode<synchronous>, transform_indices = @transform_2, window_bounds = array<i64: 1, 32>}, {pipeline_mode = #tpu.pipeline_mode<synchronous>, transform_indices = @transform_3, window_bounds = array<i64: 32, 32>}, {pipeline_mode = #tpu.pipeline_mode<synchronous>, transform_indices = @transform_4, window_bounds = array<i64: 1, 32>}, {pipeline_mode = #tpu.pipeline_mode<synchronous>, transform_indices = @transform_5, window_bounds = array<i64: 32, 8>}, {pipeline_mode = #tpu.pipeline_mode<synchronous>, transform_indices = @transform_6, window_bounds = array<i64: 1, 8>}, {transform_indices = @transform_7, window_bounds = array<i64: 8, 8>}]} {
    %c0 = arith.constant 0 : index
    %c0_0 = arith.constant 0 : index
    %0 = vector.load %arg1[%c0, %c0_0] : memref<8x8xf32, #tpu.memory_space<vmem>>, vector<8x8xf32>
    %c0_1 = arith.constant 0 : index
    %c0_2 = arith.constant 0 : index
    %1 = vector.load %arg2[%c0_1, %c0_2] : memref<8x32xf32, #tpu.memory_space<vmem>>, vector<8x32xf32>
    %cst = arith.constant dense<0.000000e+00> : vector<8x32xf32>
    %2 = tpu.matmul %0, %1, %cst {dimension_numbers = #tpu.dot_dimension_numbers<[1], [0], [0], [1], [0, 0, 1, 1], [], []>} : vector<8x8xf32>, vector<8x32xf32>, vector<8x32xf32> -> vector<8x32xf32>
    %c0_3 = arith.constant 0 : index
    %c0_4 = arith.constant 0 : index
    %3 = vector.load %arg3[%c0_3, %c0_4] : memref<1x32xf32, #tpu.memory_space<vmem>>, vector<1x32xf32>
    %4 = vector.broadcast %3 : vector<1x32xf32> to vector<8x32xf32>
    %5 = arith.addf %2, %4 : vector<8x32xf32>
    %6 = math.tanh %5 : vector<8x32xf32>
    %c0_5 = arith.constant 0 : index
    %c0_6 = arith.constant 0 : index
    %7 = vector.load %arg4[%c0_5, %c0_6] : memref<32x32xf32, #tpu.memory_space<vmem>>, vector<32x32xf32>
    %cst_7 = arith.constant dense<0.000000e+00> : vector<8x32xf32>
    %8 = tpu.matmul %6, %7, %cst_7 {dimension_numbers = #tpu.dot_dimension_numbers<[1], [0], [0], [1], [0, 0, 1, 1], [], []>} : vector<8x32xf32>, vector<32x32xf32>, vector<8x32xf32> -> vector<8x32xf32>
    %c0_8 = arith.constant 0 : index
    %c0_9 = arith.constant 0 : index
    %9 = vector.load %arg5[%c0_8, %c0_9] : memref<1x32xf32, #tpu.memory_space<vmem>>, vector<1x32xf32>
    %10 = vector.broadcast %9 : vector<1x32xf32> to vector<8x32xf32>
    %11 = arith.addf %8, %10 : vector<8x32xf32>
    %12 = math.tanh %11 : vector<8x32xf32>
    %c0_10 = arith.constant 0 : index
    %c0_11 = arith.constant 0 : index
    %13 = vector.load %arg6[%c0_10, %c0_11] : memref<32x8xf32, #tpu.memory_space<vmem>>, vector<32x8xf32>
    %cst_12 = arith.constant dense<0.000000e+00> : vector<8x8xf32>
    %14 = tpu.matmul %12, %13, %cst_12 {dimension_numbers = #tpu.dot_dimension_numbers<[1], [0], [0], [1], [0, 0, 1, 1], [], []>} : vector<8x32xf32>, vector<32x8xf32>, vector<8x8xf32> -> vector<8x8xf32>
    %c0_13 = arith.constant 0 : index
    %c0_14 = arith.constant 0 : index
    %15 = vector.load %arg7[%c0_13, %c0_14] : memref<1x8xf32, #tpu.memory_space<vmem>>, vector<1x8xf32>
    %16 = vector.broadcast %15 : vector<1x8xf32> to vector<8x8xf32>
    %17 = arith.addf %14, %16 : vector<8x8xf32>
    %c0_15 = arith.constant 0 : index
    %c0_16 = arith.constant 0 : index
    %18 = vector.load %arg8[%c0_15, %c0_16] : memref<8x8xf32, #tpu.memory_space<vmem>>, vector<8x8xf32>
    tpu.vector_store %arg8[%c0_15, %c0_16], %17 {strides = array<i32>} : memref<8x8xf32, #tpu.memory_space<vmem>>, vector<8x8xf32>,
    return
  }
  func.func @transform_0(%arg0: i32) -> (i32, i32) {
    %c0_i32 = arith.constant 0 : i32
    %c0_i32_0 = arith.constant 0 : i32
    return %arg0, %c0_i32 : i32, i32
  }
  func.func @transform_1(%arg0: i32) -> (i32, i32) {
    %c0_i32 = arith.constant 0 : i32
    %c0_i32_0 = arith.constant 0 : i32
    %c0_i32_1 = arith.constant 0 : i32
    return %c0_i32, %c0_i32_0 : i32, i32
  }
  func.func @transform_2(%arg0: i32) -> (i32, i32) {
    %c0_i32 = arith.constant 0 : i32
    %c0_i32_0 = arith.constant 0 : i32
    %c0_i32_1 = arith.constant 0 : i32
    return %c0_i32, %c0_i32_0 : i32, i32
  }
  func.func @transform_3(%arg0: i32) -> (i32, i32) {
    %c0_i32 = arith.constant 0 : i32
    %c0_i32_0 = arith.constant 0 : i32
    %c0_i32_1 = arith.constant 0 : i32
    return %c0_i32, %c0_i32_0 : i32, i32
  }
  func.func @transform_4(%arg0: i32) -> (i32, i32) {
    %c0_i32 = arith.constant 0 : i32
    %c0_i32_0 = arith.constant 0 : i32
    %c0_i32_1 = arith.constant 0 : i32
    return %c0_i32, %c0_i32_0 : i32, i32
  }
  func.func @transform_5(%arg0: i32) -> (i32, i32) {
    %c0_i32 = arith.constant 0 : i32
    %c0_i32_0 = arith.constant 0 : i32
    %c0_i32_1 = arith.constant 0 : i32
    return %c0_i32, %c0_i32_0 : i32, i32
  }
  func.func @transform_6(%arg0: i32) -> (i32, i32) {
    %c0_i32 = arith.constant 0 : i32
    %c0_i32_0 = arith.constant 0 : i32
    %c0_i32_1 = arith.constant 0 : i32
    return %c0_i32, %c0_i32_0 : i32, i32
  }
  func.func @transform_7(%arg0: i32) -> (i32, i32) {
    %c0_i32 = arith.constant 0 : i32
    %c0_i32_0 = arith.constant 0 : i32
    return %arg0, %c0_i32 : i32, i32
  }
}

</mosaic_0001>

<bundles_post_ra>
// kernel: tpu_custom_call.1
= control target key start
LH: loop header
LB: loop body
LE: loop exit
PB: predicated region body
PF: predicated region fallthrough
CT: control target
= control target key end

     0   :  { %12 = vsyncpa [#allocation3], 0  ;;  %s306_s0 = inlined_call_operand.vmem [shape: f32[8,8], index: 0, kind: input, shape index: {}]   ;;  %s307_s1 = inlined_call_operand.hbm [shape: f32[8,32], index: 1, kind: input, shape index: {}]   ;;  %s308_s2 = inlined_call_operand.vmem [shape: f32[1,32], index: 2, kind: input, shape index: {}]   ;;  %s309_s3 = inlined_call_operand.vmem [shape: f32[32,32], index: 3, kind: input, shape index: {}]   ;;  %s310_s4 = inlined_call_operand.vmem [shape: f32[1,32], index: 4, kind: input, shape index: {}]   ;;  %s311_s5 = inlined_call_operand.vmem [shape: f32[32,8], index: 5, kind: input, shape index: {}]   ;;  %s312_s6 = inlined_call_operand.vmem [shape: f32[1,8], index: 6, kind: input, shape index: {}]   ;;  %s313_s7 = inlined_call_operand.hbm [shape: f32[8,8], index: 7, kind: output, shape index: {}]  }
   0x1   :  { %13 = vsyncpa [#allocation4], 0  ;;  %s21_s26 = sshll.u32 %s307_s1, 4  ;;  %s218_s27 = smov [#allocation2]   ;;  %s22_s26 = int_to_ptr.hbm [resolvable:$true] %s21_s26 }
   0x2   :  { %s23_s28 = sshll.u32 %s218_s27, 4  ;;  %s24_s28 = int_to_ptr.vmem [resolvable:$true] %s23_s28 }
   0x3   :  { %26 = dma.hbm_to_vmem [thread:$0]  %s22_s26, 128, %s24_s28, [#allocation3]  }
   0x4   :  { %214 = dma.done.wait [#allocation3], 128  }
   0x5   :  { %215 = vsyncadd [#allocation3], 4294967168  ;;  %vm47_vm0 = vcmask 64512   ;;  %v42_v0 = vld [vmem:[#allocation2] sm:$0xff]  ;;  %v75_v2 = vld [vmem:[%s309_s3 + $0x18] sm:$0xff]  ;;  %vm80_vm1 = vcmask 261120  }
   0x6   :  { %v41_v1 = vld [vmem:[%s306_s0] sm:$0xff]  ;;  %66 = vmatpush.msra.mxu0 %v42_v0  ;;  %96 = vmatpush.msra.mxu1 %v75_v2  ;;  %v74_v3 = vld [vmem:[%s309_s3 + $0x10] sm:$0xff]  ;;  %v73_v4 = vld [vmem:[%s309_s3 + $0x8] sm:$0xff]  ;;  %s219_s26 = smov [#allocation5]   ;;  %s144_s29 = sshll.u32 %s313_s7, 4  ;;  %s145_s29 = int_to_ptr.hbm [resolvable:$true] %s144_s29 }
   0x7   :  { %154 = vmatmul.msk.f32.vlgmr.msra.gmra.mxu0 %vm47_vm0, %v41_v1  ;;  %v72_v5 = vld [vmem:[%s309_s3] sm:$0xff]  ;;  %v108_v10 = vld [vmem:[%s311_s5 + $0x18] sm:$0xff]  ;;  %v107_v11 = vld [vmem:[%s311_s5 + $0x10] sm:$0xff]  ;;  %s142_s27 = sshll.u32 %s219_s26, 4  ;;  %s143_s27 = int_to_ptr.vmem [resolvable:$true] %s142_s27 }
   0x8   :  { %97 = vmatpush.msra.mxu1 %v74_v3  ;;  %v159_v6 = vld [vmem:[%s308_s2] ss:$0 sm:$0xff]  ;;  %128 = vmatpush.msra.mxu2 %v108_v10  ;;  %v106_v12 = vld [vmem:[%s311_s5 + $0x8] sm:$0xff] }
   0x9   :  { %v105_v13 = vld [vmem:[%s311_s5] sm:$0xff] }
   0xa   :  { %98 = vmatpush.msra.mxu1 %v73_v4  ;;  %129 = vmatpush.msra.mxu2 %v107_v11  ;;  %v160_v14 = vld [vmem:[%s310_s4] ss:$0 sm:$0xff] }
   0xb   :  { %v161_v18 = vld [vmem:[%s312_s6] ss:$0 sm:$0xff] }
   0xc   :  { %99 = vmatpush.msra.mxu1 %v72_v5  ;;  %130 = vmatpush.msra.mxu2 %v106_v12 }
   0xe   :  { %131 = vmatpush.msra.mxu2 %v105_v13 }
  0x84   :  { %v68_v7 = vpop.f32.mrf.mxu0 }
  0x85   :  { %v69_v8 = vadd.f32 %v159_v6, %v68_v7 }
  0x87   :  { %162 = vtanh.f32 %v69_v8 }
  0x8d   :  { %v163_v9 = vpop.eup %162 }
  0x8e   :  { %155 = vmatmul.msk.f32.vlgmr.msra.gmra.mxu1 %vm80_vm1, %v163_v9 }
 0x10b   :  { %v101_v15 = vpop.f32.mrf.mxu1 }
 0x10c   :  { %v102_v16 = vadd.f32 %v160_v14, %v101_v15 }
 0x10e   :  { %164 = vtanh.f32 %v102_v16 }
 0x114   :  { %v165_v17 = vpop.eup %164 }
 0x115   :  { %156 = vmatmul.msk.f32.vlgmr.msra.gmra.mxu2 %vm80_vm1, %v165_v17 }
 0x198   :  { %v133_v19 = vpop.f32.mrf.mxu2 }
 0x199   :  { %v134_v20 = vadd.f32 %v161_v18, %v133_v19 }
 0x19b   :  { %136 = vst.msk [vmem:[#allocation5] sm:$0xff] %vm47_vm0, %v134_v20 }
 0x19c   :  { %147 = dma.vmem_to_hbm [thread:$0]  %s143_s27, 128, %s145_s29, [#allocation4]  }
 0x19d   :  { %216 = dma.done.wait [#allocation4], 128  }
 0x19e   :  { %217 = vsyncadd [#allocation4], 4294967168 }
 0x19f   :  { %152 = vsyncpa [#allocation3], 1 }
 0x1a0   :  { %153 = vsyncpa [#allocation4], 1 }

</bundles_post_ra>
